<compile_context>
chip_gen: v7x
topology: tpu7x:2x2x1
jax: 0.10.0
libtpu: 0.0.40
codegen_flags: <defaults>
</compile_context>

<pallas_src>
import functools

import numpy as np
import jax
import jax.numpy as jnp
from jax import lax
from jax.experimental import pallas as pl
from jax.experimental.pallas import tpu as pltpu

REMAP_TO_80 = [1, 2, 3, 4, 5, 6, 7, 8, 9, 10, 11, 13, 14, 15, 16, 17, 18, 19,
               20, 21, 22, 23, 24, 25, 27, 28, 31, 32, 33, 34, 35, 36, 37, 38,
               39, 40, 41, 42, 43, 44, 46, 47, 48, 49, 50, 51, 52, 53, 54, 55,
               56, 57, 58, 59, 60, 61, 62, 63, 64, 65, 67, 70, 72, 73, 74, 75,
               76, 77, 78, 79, 80, 81, 82, 84, 85, 86, 87, 88, 89, 90]
assert len(REMAP_TO_80) == 80


# ----------------------------------------------------------------------------
# Fused kernel: bias-max scoring + packed-key top-k + one-hot-matmul gather of
# all layers (main + aux), one batch per grid step.
# ----------------------------------------------------------------------------
def _resetter_kernel(bias_ref, sel_ref, x_ref, out_ref, *, k, nq, L,
                     idx_bits, unroll):
    # x_ref   : (L, nq, Cp)  f32  [logits | boxes] per layer, one batch
    # out_ref : (L, k, 128)  f32  lanes 0..79 remapped logits, 80..83 boxes
    # bias_ref: (1, Cp)      f32  0 on remapped classes, -1e30 elsewhere
    # sel_ref : (Cp, 128)    f32  column-selection / remap matrix

    # ---- 1) per-query score = max over the 80 remapped classes (main layer).
    masked = x_ref[0] + bias_ref[...]                        # (nq, Cp) VPU add
    scores = jnp.max(masked, axis=-1).reshape(1, nq)         # (1, nq) lane-major

    # ---- 2) iterative top-k with a single cross-lane reduce per iteration.
    # Pack each score into a totally-ordered int32 key:
    #   high bits: sortable-int transform of the f32 score (low idx_bits
    #              mantissa bits quantized away)
    #   low bits : (nq-1-lane) -> max() tie-breaks to the LOWEST query index.
    lane = lax.broadcasted_iota(jnp.int32, (1, nq), 1)
    sbits = pltpu.bitcast(scores, jnp.int32)
    sortable = jnp.where(sbits < 0, sbits ^ jnp.int32(0x7FFFFFFF), sbits)
    keys0 = ((sortable >> idx_bits) << idx_bits) | (jnp.int32(nq - 1) - lane)

    row = lax.broadcasted_iota(jnp.int32, (k, 1), 0)          # (k, 1)
    neg_key = np.int32(np.iinfo(np.int32).min)
    idx_mask = jnp.int32((1 << idx_bits) - 1)

    def topk_body(i, carry):
        keys, idx_vec = carry
        best = jnp.max(keys)                                  # one XLU reduce
        sel_idx = jnp.int32(nq - 1) - (best & idx_mask)       # unpack argmax
        idx_vec = jnp.where(row == i, sel_idx, idx_vec)       # record slot i
        keys = jnp.where(lane == sel_idx, neg_key, keys)      # knock out lane
        return keys, idx_vec

    _, idx_vec = lax.fori_loop(
        0, k, topk_body,
        (keys0, jnp.zeros((k, 1), jnp.int32)),
        unroll=unroll)

    # ---- 3) build the one-hot once; gather + class remap on the MXU.
    col = lax.broadcasted_iota(jnp.int32, (k, nq), 1)
    onehot = (col == idx_vec).astype(jnp.float32)             # (k, nq)
    sel = sel_ref[...]                                         # (Cp, 128)
    for l in range(L):
        g = jnp.dot(onehot, x_ref[l],
                    preferred_element_type=jnp.float32)        # (k, Cp)
        out_ref[l] = jnp.dot(g, sel,
                             preferred_element_type=jnp.float32
                             ).astype(out_ref.dtype)           # (k, 128) dense


# ----------------------------------------------------------------------------
# Wrapper reproducing DetaResetter.forward semantics (returns a new dict).
# ----------------------------------------------------------------------------
def deta_resetter(teacher_outputs, student_num_queries):
    main_logits = teacher_outputs['pred_logits']   # (bs, nq, C)
    main_boxes = teacher_outputs['pred_boxes']     # (bs, nq, 4)
    aux = teacher_outputs.get('aux_outputs', [])
    logits_list = [main_logits] + [a['pred_logits'] for a in aux]
    boxes_list = [main_boxes] + [a['pred_boxes'] for a in aux]
    L = len(logits_list)
    bs, nq, C = main_logits.shape
    k = int(student_num_queries)
    if not (1 <= k <= nq):
        raise ValueError(
            f"student_num_queries={k} must be in [1, num_queries={nq}]")
    Cp = C + 4
    idx_bits = max(1, int(nq - 1).bit_length())
    unroll = True if k <= 16 else 4

    # Stacked kernel input: (L, bs, nq, C+4) = [logits | boxes] per layer.
    x_all = jnp.stack(
        [jnp.concatenate([lg.astype(jnp.float32), bx.astype(jnp.float32)],
                         axis=-1)
         for lg, bx in zip(logits_list, boxes_list)], axis=0)

    # Static remap constants (plain numpy -> baked-in literals, no XLA scatter):
    #   sel[remap[j], j]   = 1 for j < 80  (class remap -> lanes 0..79)
    #   sel[C + j, 80 + j] = 1 for j < 4   (boxes       -> lanes 80..83)
    #   bias[0, c] = 0 iff class c is in the remap set, else -1e30
    sel_np = np.zeros((Cp, 128), dtype=np.float32)
    sel_np[np.asarray(REMAP_TO_80), np.arange(80)] = 1.0
    sel_np[C + np.arange(4), 80 + np.arange(4)] = 1.0
    bias_np = np.full((1, Cp), -1e30, dtype=np.float32)
    bias_np[0, np.asarray(REMAP_TO_80)] = 0.0
    sel = jnp.asarray(sel_np)
    bias = jnp.asarray(bias_np)

    kernel = functools.partial(_resetter_kernel, k=k, nq=nq, L=L,
                               idx_bits=idx_bits, unroll=unroll)

    out = pl.pallas_call(
        kernel,
        out_shape=jax.ShapeDtypeStruct((L, bs, k, 128), jnp.float32),
        grid_spec=pltpu.PrefetchScalarGridSpec(
            num_scalar_prefetch=0,
            grid=(bs,),
            in_specs=[
                pl.BlockSpec((1, Cp), lambda b: (0, 0)),            # bias
                pl.BlockSpec((Cp, 128), lambda b: (0, 0)),          # sel
                pl.BlockSpec((L, None, nq, Cp), lambda b: (0, b, 0, 0)),
            ],
            out_specs=pl.BlockSpec((L, None, k, 128), lambda b: (0, b, 0, 0)),
        ),
        compiler_params=pltpu.CompilerParams(
            dimension_semantics=("parallel",)),
    )(bias, sel, x_all)

    out_dict = dict(teacher_outputs)
    out_dict['pred_logits'] = out[0, :, :, :80].astype(main_logits.dtype)
    out_dict['pred_boxes'] = out[0, :, :, 80:84].astype(main_boxes.dtype)
    if 'aux_outputs' in teacher_outputs:
        out_dict['aux_outputs'] = [
            {'pred_logits':
                 out[1 + i, :, :, :80].astype(aux[i]['pred_logits'].dtype),
             'pred_boxes':
                 out[1 + i, :, :, 80:84].astype(aux[i]['pred_boxes'].dtype)}
            for i in range(len(aux))
        ]
    return out_dict


if __name__ == "__main__":
    bs, nq, C, k, n_aux = 2, 16, 91, 8, 2

    key = jax.random.PRNGKey(0)
    keys = jax.random.split(key, 2 + 2 * n_aux)
    logits = jax.random.normal(keys[0], (bs, nq, C), jnp.float32)
    boxes = jax.random.uniform(keys[1], (bs, nq, 4), jnp.float32)
    aux = []
    for i in range(n_aux):
        aux.append({
            'pred_logits': jax.random.normal(keys[2 + 2 * i], (bs, nq, C),
                                             jnp.float32),
            'pred_boxes': jax.random.uniform(keys[3 + 2 * i], (bs, nq, 4),
                                             jnp.float32),
        })
    teacher_outputs = {'pred_logits': logits, 'pred_boxes': boxes,
                       'aux_outputs': aux}

    out = deta_resetter(teacher_outputs, k)
    jax.block_until_ready(out['pred_logits'])
    jax.block_until_ready(out['pred_boxes'])

    # pure-JAX reference check
    remap = jnp.asarray(REMAP_TO_80, dtype=jnp.int32)
    rl = logits[:, :, remap]
    ref_inds = jax.lax.top_k(rl.max(axis=-1), k)[1]
    bidx = jnp.arange(bs)[:, None]
    ref_logits = rl[bidx, ref_inds, :]
    ref_boxes = boxes[bidx, ref_inds, :]
    # Gathers run through the MXU (multi-pass f32 matmul), so compare at 1e-5.
    np.testing.assert_allclose(np.asarray(out['pred_logits']),
                               np.asarray(ref_logits), rtol=1e-5, atol=1e-5)
    np.testing.assert_allclose(np.asarray(out['pred_boxes']),
                               np.asarray(ref_boxes), rtol=1e-5, atol=1e-5)
    for i in range(n_aux):
        arl = aux[i]['pred_logits'][:, :, remap][bidx, ref_inds, :]
        arb = aux[i]['pred_boxes'][bidx, ref_inds, :]
        np.testing.assert_allclose(
            np.asarray(out['aux_outputs'][i]['pred_logits']),
            np.asarray(arl), rtol=1e-5, atol=1e-5)
        np.testing.assert_allclose(
            np.asarray(out['aux_outputs'][i]['pred_boxes']),
            np.asarray(arb), rtol=1e-5, atol=1e-5)

    print("KERNEL_OK")
</pallas_src>

<mosaic_0001>
module attributes {stable_mosaic.version = 11 : i64} {
  func.func @_resetter_kernel(%arg0: i32, %arg1: memref<1x95xf32, #tpu.memory_space<vmem>>, %arg2: memref<95x128xf32, #tpu.memory_space<vmem>>, %arg3: memref<3x1x16x95xf32, #tpu.memory_space<vmem>>, %arg4: memref<3x1x8x128xf32, #tpu.memory_space<vmem>>) attributes {dimension_semantics = [#tpu.dimension_semantics<parallel>], iteration_bounds = array<i64: 2>, scalar_prefetch = 0 : i64, scratch_operands = 0 : i64, tpu.core_type = #tpu.core_type<tc>, window_params = [{pipeline_mode = #tpu.pipeline_mode<synchronous>, transform_indices = @transform_0, window_bounds = array<i64: 1, 95>}, {pipeline_mode = #tpu.pipeline_mode<synchronous>, transform_indices = @transform_1, window_bounds = array<i64: 95, 128>}, {transform_indices = @transform_2, window_bounds = array<i64: 3, 1, 16, 95>}, {transform_indices = @transform_3, window_bounds = array<i64: 3, 1, 8, 128>}]} {
    %c0 = arith.constant 0 : index
    %c0_0 = arith.constant 0 : index
    %c0_1 = arith.constant 0 : index
    %c0_2 = arith.constant 0 : index
    %0 = vector.load %arg3[%c0, %c0_0, %c0_1, %c0_2] : memref<3x1x16x95xf32, #tpu.memory_space<vmem>>, vector<1x1x16x95xf32>
    %1 = vector.shape_cast %0 : vector<1x1x16x95xf32> to vector<16x95xf32>
    %c0_3 = arith.constant 0 : index
    %c0_4 = arith.constant 0 : index
    %2 = vector.load %arg1[%c0_3, %c0_4] : memref<1x95xf32, #tpu.memory_space<vmem>>, vector<1x95xf32>
    %3 = vector.broadcast %2 : vector<1x95xf32> to vector<16x95xf32>
    %4 = arith.addf %1, %3 : vector<16x95xf32>
    %cst = arith.constant dense<0xFF800000> : vector<16xf32>
    %5 = vector.multi_reduction <maximumf>, %4, %cst [1] : vector<16x95xf32> to vector<16xf32>
    %6 = vector.shape_cast %5 : vector<16xf32> to vector<1x16xf32>
    %7 = tpu.iota {dimensions = array<i32: 1>} : vector<1x16xi32>
    %8 = tpu.bitcast %6 : vector<1x16xf32> -> vector<1x16xi32>
    %c0_i32 = arith.constant 0 : i32
    %9 = vector.broadcast %c0_i32 : i32 to vector<1x16xi32>
    %10 = arith.cmpi slt, %8, %9 : vector<1x16xi32>
    %c2147483647_i32 = arith.constant 2147483647 : i32
    %11 = vector.broadcast %c2147483647_i32 : i32 to vector<1x16xi32>
    %12 = arith.xori %8, %11 : vector<1x16xi32>
    %13 = arith.select %10, %12, %8 : vector<1x16xi1>, vector<1x16xi32>
    %c4_i32 = arith.constant 4 : i32
    %14 = vector.broadcast %c4_i32 : i32 to vector<1x16xi32>
    %15 = arith.shrsi %13, %14 : vector<1x16xi32>
    %c4_i32_5 = arith.constant 4 : i32
    %16 = vector.broadcast %c4_i32_5 : i32 to vector<1x16xi32>
    %17 = arith.shli %15, %16 : vector<1x16xi32>
    %c15_i32 = arith.constant 15 : i32
    %18 = vector.broadcast %c15_i32 : i32 to vector<1x16xi32>
    %19 = arith.subi %18, %7 : vector<1x16xi32>
    %20 = arith.ori %17, %19 : vector<1x16xi32>
    %21 = tpu.iota {dimensions = array<i32: 0>} : vector<8x1xi32>
    %c0_i32_6 = arith.constant 0 : i32
    %22 = vector.broadcast %c0_i32_6 : i32 to vector<8x1xi32>
    %c15_i32_7 = arith.constant 15 : i32
    %c0_i32_8 = arith.constant 0 : i32
    %23 = vector.shape_cast %20 : vector<1x16xi32> to vector<1x1x16xi32>
    %cst_9 = arith.constant dense<-2147483648> : vector<1xi32>
    %24 = vector.multi_reduction <maxsi>, %23, %cst_9 [1, 2] : vector<1x1x16xi32> to vector<1xi32>
    %25 = vector.shape_cast %24 : vector<1xi32> to vector<1x1x1xi32>
    %26 = vector.extract %25[0, 0, 0] : i32 from vector<1x1x1xi32>
    %27 = arith.andi %26, %c15_i32_7 : i32
    %c15_i32_10 = arith.constant 15 : i32
    %28 = arith.subi %c15_i32_10, %27 : i32
    %29 = vector.broadcast %c0_i32_8 : i32 to vector<8x1xi32>
    %30 = arith.cmpi eq, %21, %29 : vector<8x1xi32>
    %31 = vector.broadcast %28 : i32 to vector<8x1xi32>
    %32 = arith.select %30, %31, %22 : vector<8x1xi1>, vector<8x1xi32>
    %33 = vector.broadcast %28 : i32 to vector<1x16xi32>
    %34 = arith.cmpi eq, %7, %33 : vector<1x16xi32>
    %c-2147483648_i32 = arith.constant -2147483648 : i32
    %35 = vector.broadcast %c-2147483648_i32 : i32 to vector<1x16xi32>
    %36 = arith.select %34, %35, %20 : vector<1x16xi1>, vector<1x16xi32>
    %c1_i32 = arith.constant 1 : i32
    %37 = vector.shape_cast %36 : vector<1x16xi32> to vector<1x1x16xi32>
    %cst_11 = arith.constant dense<-2147483648> : vector<1xi32>
    %38 = vector.multi_reduction <maxsi>, %37, %cst_11 [1, 2] : vector<1x1x16xi32> to vector<1xi32>
    %39 = vector.shape_cast %38 : vector<1xi32> to vector<1x1x1xi32>
    %40 = vector.extract %39[0, 0, 0] : i32 from vector<1x1x1xi32>
    %41 = arith.andi %40, %c15_i32_7 : i32
    %c15_i32_12 = arith.constant 15 : i32
    %42 = arith.subi %c15_i32_12, %41 : i32
    %43 = vector.broadcast %c1_i32 : i32 to vector<8x1xi32>
    %44 = arith.cmpi eq, %21, %43 : vector<8x1xi32>
    %45 = vector.broadcast %42 : i32 to vector<8x1xi32>
    %46 = arith.select %44, %45, %32 : vector<8x1xi1>, vector<8x1xi32>
    %47 = vector.broadcast %42 : i32 to vector<1x16xi32>
    %48 = arith.cmpi eq, %7, %47 : vector<1x16xi32>
    %c-2147483648_i32_13 = arith.constant -2147483648 : i32
    %49 = vector.broadcast %c-2147483648_i32_13 : i32 to vector<1x16xi32>
    %50 = arith.select %48, %49, %36 : vector<1x16xi1>, vector<1x16xi32>
    %c2_i32 = arith.constant 2 : i32
    %51 = vector.shape_cast %50 : vector<1x16xi32> to vector<1x1x16xi32>
    %cst_14 = arith.constant dense<-2147483648> : vector<1xi32>
    %52 = vector.multi_reduction <maxsi>, %51, %cst_14 [1, 2] : vector<1x1x16xi32> to vector<1xi32>
    %53 = vector.shape_cast %52 : vector<1xi32> to vector<1x1x1xi32>
    %54 = vector.extract %53[0, 0, 0] : i32 from vector<1x1x1xi32>
    %55 = arith.andi %54, %c15_i32_7 : i32
    %c15_i32_15 = arith.constant 15 : i32
    %56 = arith.subi %c15_i32_15, %55 : i32
    %57 = vector.broadcast %c2_i32 : i32 to vector<8x1xi32>
    %58 = arith.cmpi eq, %21, %57 : vector<8x1xi32>
    %59 = vector.broadcast %56 : i32 to vector<8x1xi32>
    %60 = arith.select %58, %59, %46 : vector<8x1xi1>, vector<8x1xi32>
    %61 = vector.broadcast %56 : i32 to vector<1x16xi32>
    %62 = arith.cmpi eq, %7, %61 : vector<1x16xi32>
    %c-2147483648_i32_16 = arith.constant -2147483648 : i32
    %63 = vector.broadcast %c-2147483648_i32_16 : i32 to vector<1x16xi32>
    %64 = arith.select %62, %63, %50 : vector<1x16xi1>, vector<1x16xi32>
    %c3_i32 = arith.constant 3 : i32
    %65 = vector.shape_cast %64 : vector<1x16xi32> to vector<1x1x16xi32>
    %cst_17 = arith.constant dense<-2147483648> : vector<1xi32>
    %66 = vector.multi_reduction <maxsi>, %65, %cst_17 [1, 2] : vector<1x1x16xi32> to vector<1xi32>
    %67 = vector.shape_cast %66 : vector<1xi32> to vector<1x1x1xi32>
    %68 = vector.extract %67[0, 0, 0] : i32 from vector<1x1x1xi32>
    %69 = arith.andi %68, %c15_i32_7 : i32
    %c15_i32_18 = arith.constant 15 : i32
    %70 = arith.subi %c15_i32_18, %69 : i32
    %71 = vector.broadcast %c3_i32 : i32 to vector<8x1xi32>
    %72 = arith.cmpi eq, %21, %71 : vector<8x1xi32>
    %73 = vector.broadcast %70 : i32 to vector<8x1xi32>
    %74 = arith.select %72, %73, %60 : vector<8x1xi1>, vector<8x1xi32>
    %75 = vector.broadcast %70 : i32 to vector<1x16xi32>
    %76 = arith.cmpi eq, %7, %75 : vector<1x16xi32>
    %c-2147483648_i32_19 = arith.constant -2147483648 : i32
    %77 = vector.broadcast %c-2147483648_i32_19 : i32 to vector<1x16xi32>
    %78 = arith.select %76, %77, %64 : vector<1x16xi1>, vector<1x16xi32>
    %c4_i32_20 = arith.constant 4 : i32
    %79 = vector.shape_cast %78 : vector<1x16xi32> to vector<1x1x16xi32>
    %cst_21 = arith.constant dense<-2147483648> : vector<1xi32>
    %80 = vector.multi_reduction <maxsi>, %79, %cst_21 [1, 2] : vector<1x1x16xi32> to vector<1xi32>
    %81 = vector.shape_cast %80 : vector<1xi32> to vector<1x1x1xi32>
    %82 = vector.extract %81[0, 0, 0] : i32 from vector<1x1x1xi32>
    %83 = arith.andi %82, %c15_i32_7 : i32
    %c15_i32_22 = arith.constant 15 : i32
    %84 = arith.subi %c15_i32_22, %83 : i32
    %85 = vector.broadcast %c4_i32_20 : i32 to vector<8x1xi32>
    %86 = arith.cmpi eq, %21, %85 : vector<8x1xi32>
    %87 = vector.broadcast %84 : i32 to vector<8x1xi32>
    %88 = arith.select %86, %87, %74 : vector<8x1xi1>, vector<8x1xi32>
    %89 = vector.broadcast %84 : i32 to vector<1x16xi32>
    %90 = arith.cmpi eq, %7, %89 : vector<1x16xi32>
    %c-2147483648_i32_23 = arith.constant -2147483648 : i32
    %91 = vector.broadcast %c-2147483648_i32_23 : i32 to vector<1x16xi32>
    %92 = arith.select %90, %91, %78 : vector<1x16xi1>, vector<1x16xi32>
    %c5_i32 = arith.constant 5 : i32
    %93 = vector.shape_cast %92 : vector<1x16xi32> to vector<1x1x16xi32>
    %cst_24 = arith.constant dense<-2147483648> : vector<1xi32>
    %94 = vector.multi_reduction <maxsi>, %93, %cst_24 [1, 2] : vector<1x1x16xi32> to vector<1xi32>
    %95 = vector.shape_cast %94 : vector<1xi32> to vector<1x1x1xi32>
    %96 = vector.extract %95[0, 0, 0] : i32 from vector<1x1x1xi32>
    %97 = arith.andi %96, %c15_i32_7 : i32
    %c15_i32_25 = arith.constant 15 : i32
    %98 = arith.subi %c15_i32_25, %97 : i32
    %99 = vector.broadcast %c5_i32 : i32 to vector<8x1xi32>
    %100 = arith.cmpi eq, %21, %99 : vector<8x1xi32>
    %101 = vector.broadcast %98 : i32 to vector<8x1xi32>
    %102 = arith.select %100, %101, %88 : vector<8x1xi1>, vector<8x1xi32>
    %103 = vector.broadcast %98 : i32 to vector<1x16xi32>
    %104 = arith.cmpi eq, %7, %103 : vector<1x16xi32>
    %c-2147483648_i32_26 = arith.constant -2147483648 : i32
    %105 = vector.broadcast %c-2147483648_i32_26 : i32 to vector<1x16xi32>
    %106 = arith.select %104, %105, %92 : vector<1x16xi1>, vector<1x16xi32>
    %c6_i32 = arith.constant 6 : i32
    %107 = vector.shape_cast %106 : vector<1x16xi32> to vector<1x1x16xi32>
    %cst_27 = arith.constant dense<-2147483648> : vector<1xi32>
    %108 = vector.multi_reduction <maxsi>, %107, %cst_27 [1, 2] : vector<1x1x16xi32> to vector<1xi32>
    %109 = vector.shape_cast %108 : vector<1xi32> to vector<1x1x1xi32>
    %110 = vector.extract %109[0, 0, 0] : i32 from vector<1x1x1xi32>
    %111 = arith.andi %110, %c15_i32_7 : i32
    %c15_i32_28 = arith.constant 15 : i32
    %112 = arith.subi %c15_i32_28, %111 : i32
    %113 = vector.broadcast %c6_i32 : i32 to vector<8x1xi32>
    %114 = arith.cmpi eq, %21, %113 : vector<8x1xi32>
    %115 = vector.broadcast %112 : i32 to vector<8x1xi32>
    %116 = arith.select %114, %115, %102 : vector<8x1xi1>, vector<8x1xi32>
    %117 = vector.broadcast %112 : i32 to vector<1x16xi32>
    %118 = arith.cmpi eq, %7, %117 : vector<1x16xi32>
    %c-2147483648_i32_29 = arith.constant -2147483648 : i32
    %119 = vector.broadcast %c-2147483648_i32_29 : i32 to vector<1x16xi32>
    %120 = arith.select %118, %119, %106 : vector<1x16xi1>, vector<1x16xi32>
    %c7_i32 = arith.constant 7 : i32
    %121 = vector.shape_cast %120 : vector<1x16xi32> to vector<1x1x16xi32>
    %cst_30 = arith.constant dense<-2147483648> : vector<1xi32>
    %122 = vector.multi_reduction <maxsi>, %121, %cst_30 [1, 2] : vector<1x1x16xi32> to vector<1xi32>
    %123 = vector.shape_cast %122 : vector<1xi32> to vector<1x1x1xi32>
    %124 = vector.extract %123[0, 0, 0] : i32 from vector<1x1x1xi32>
    %125 = arith.andi %124, %c15_i32_7 : i32
    %c15_i32_31 = arith.constant 15 : i32
    %126 = arith.subi %c15_i32_31, %125 : i32
    %127 = vector.broadcast %c7_i32 : i32 to vector<8x1xi32>
    %128 = arith.cmpi eq, %21, %127 : vector<8x1xi32>
    %129 = vector.broadcast %126 : i32 to vector<8x1xi32>
    %130 = arith.select %128, %129, %116 : vector<8x1xi1>, vector<8x1xi32>
    %131 = vector.broadcast %126 : i32 to vector<1x16xi32>
    %132 = arith.cmpi eq, %7, %131 : vector<1x16xi32>
    %c-2147483648_i32_32 = arith.constant -2147483648 : i32
    %133 = vector.broadcast %c-2147483648_i32_32 : i32 to vector<1x16xi32>
    %134 = arith.select %132, %133, %120 : vector<1x16xi1>, vector<1x16xi32>
    %c8_i32 = arith.constant 8 : i32
    %135 = tpu.iota {dimensions = array<i32: 1>} : vector<8x16xi32>
    %136 = vector.broadcast %130 : vector<8x1xi32> to vector<8x16xi32>
    %137 = arith.cmpi eq, %135, %136 : vector<8x16xi32>
    %138 = arith.extui %137 : vector<8x16xi1> to vector<8x16xi32>
    %139 = arith.sitofp %138 : vector<8x16xi32> to vector<8x16xf32>
    %c0_33 = arith.constant 0 : index
    %c0_34 = arith.constant 0 : index
    %140 = vector.load %arg2[%c0_33, %c0_34] : memref<95x128xf32, #tpu.memory_space<vmem>>, vector<95x128xf32>
    %c0_35 = arith.constant 0 : index
    %c0_36 = arith.constant 0 : index
    %c0_37 = arith.constant 0 : index
    %c0_38 = arith.constant 0 : index
    %141 = vector.load %arg3[%c0_35, %c0_36, %c0_37, %c0_38] : memref<3x1x16x95xf32, #tpu.memory_space<vmem>>, vector<1x1x16x95xf32>
    %142 = vector.shape_cast %141 : vector<1x1x16x95xf32> to vector<16x95xf32>
    %cst_39 = arith.constant dense<0.000000e+00> : vector<8x95xf32>
    %143 = tpu.matmul %139, %142, %cst_39 {dimension_numbers = #tpu.dot_dimension_numbers<[1], [0], [0], [1], [0, 0, 1, 1], [], []>} : vector<8x16xf32>, vector<16x95xf32>, vector<8x95xf32> -> vector<8x95xf32>
    %cst_40 = arith.constant dense<0.000000e+00> : vector<8x128xf32>
    %144 = tpu.matmul %143, %140, %cst_40 {dimension_numbers = #tpu.dot_dimension_numbers<[1], [0], [0], [1], [0, 0, 1, 1], [], []>} : vector<8x95xf32>, vector<95x128xf32>, vector<8x128xf32> -> vector<8x128xf32>
    %c0_41 = arith.constant 0 : index
    %c0_42 = arith.constant 0 : index
    %c0_43 = arith.constant 0 : index
    %c0_44 = arith.constant 0 : index
    %145 = vector.load %arg4[%c0_41, %c0_42, %c0_43, %c0_44] : memref<3x1x8x128xf32, #tpu.memory_space<vmem>>, vector<1x1x8x128xf32>
    %146 = vector.shape_cast %145 : vector<1x1x8x128xf32> to vector<8x128xf32>
    %147 = vector.shape_cast %144 : vector<8x128xf32> to vector<1x1x8x128xf32>
    tpu.vector_store %arg4[%c0_41, %c0_42, %c0_43, %c0_44], %147 {strides = array<i32>} : memref<3x1x8x128xf32, #tpu.memory_space<vmem>>, vector<1x1x8x128xf32>,
    %c1 = arith.constant 1 : index
    %c0_45 = arith.constant 0 : index
    %c0_46 = arith.constant 0 : index
    %c0_47 = arith.constant 0 : index
    %148 = vector.load %arg3[%c1, %c0_45, %c0_46, %c0_47] : memref<3x1x16x95xf32, #tpu.memory_space<vmem>>, vector<1x1x16x95xf32>
    %149 = vector.shape_cast %148 : vector<1x1x16x95xf32> to vector<16x95xf32>
    %cst_48 = arith.constant dense<0.000000e+00> : vector<8x95xf32>
    %150 = tpu.matmul %139, %149, %cst_48 {dimension_numbers = #tpu.dot_dimension_numbers<[1], [0], [0], [1], [0, 0, 1, 1], [], []>} : vector<8x16xf32>, vector<16x95xf32>, vector<8x95xf32> -> vector<8x95xf32>
    %cst_49 = arith.constant dense<0.000000e+00> : vector<8x128xf32>
    %151 = tpu.matmul %150, %140, %cst_49 {dimension_numbers = #tpu.dot_dimension_numbers<[1], [0], [0], [1], [0, 0, 1, 1], [], []>} : vector<8x95xf32>, vector<95x128xf32>, vector<8x128xf32> -> vector<8x128xf32>
    %c1_50 = arith.constant 1 : index
    %c0_51 = arith.constant 0 : index
    %c0_52 = arith.constant 0 : index
    %c0_53 = arith.constant 0 : index
    %152 = vector.load %arg4[%c1_50, %c0_51, %c0_52, %c0_53] : memref<3x1x8x128xf32, #tpu.memory_space<vmem>>, vector<1x1x8x128xf32>
    %153 = vector.shape_cast %152 : vector<1x1x8x128xf32> to vector<8x128xf32>
    %154 = vector.shape_cast %151 : vector<8x128xf32> to vector<1x1x8x128xf32>
    tpu.vector_store %arg4[%c1_50, %c0_51, %c0_52, %c0_53], %154 {strides = array<i32>} : memref<3x1x8x128xf32, #tpu.memory_space<vmem>>, vector<1x1x8x128xf32>,
    %c2 = arith.constant 2 : index
    %c0_54 = arith.constant 0 : index
    %c0_55 = arith.constant 0 : index
    %c0_56 = arith.constant 0 : index
    %155 = vector.load %arg3[%c2, %c0_54, %c0_55, %c0_56] : memref<3x1x16x95xf32, #tpu.memory_space<vmem>>, vector<1x1x16x95xf32>
    %156 = vector.shape_cast %155 : vector<1x1x16x95xf32> to vector<16x95xf32>
    %cst_57 = arith.constant dense<0.000000e+00> : vector<8x95xf32>
    %157 = tpu.matmul %139, %156, %cst_57 {dimension_numbers = #tpu.dot_dimension_numbers<[1], [0], [0], [1], [0, 0, 1, 1], [], []>} : vector<8x16xf32>, vector<16x95xf32>, vector<8x95xf32> -> vector<8x95xf32>
    %cst_58 = arith.constant dense<0.000000e+00> : vector<8x128xf32>
    %158 = tpu.matmul %157, %140, %cst_58 {dimension_numbers = #tpu.dot_dimension_numbers<[1], [0], [0], [1], [0, 0, 1, 1], [], []>} : vector<8x95xf32>, vector<95x128xf32>, vector<8x128xf32> -> vector<8x128xf32>
    %c2_59 = arith.constant 2 : index
    %c0_60 = arith.constant 0 : index
    %c0_61 = arith.constant 0 : index
    %c0_62 = arith.constant 0 : index
    %159 = vector.load %arg4[%c2_59, %c0_60, %c0_61, %c0_62] : memref<3x1x8x128xf32, #tpu.memory_space<vmem>>, vector<1x1x8x128xf32>
    %160 = vector.shape_cast %159 : vector<1x1x8x128xf32> to vector<8x128xf32>
    %161 = vector.shape_cast %158 : vector<8x128xf32> to vector<1x1x8x128xf32>
    tpu.vector_store %arg4[%c2_59, %c0_60, %c0_61, %c0_62], %161 {strides = array<i32>} : memref<3x1x8x128xf32, #tpu.memory_space<vmem>>, vector<1x1x8x128xf32>,
    return
  }
  func.func @transform_0(%arg0: i32) -> (i32, i32) {
    %c0_i32 = arith.constant 0 : i32
    %c0_i32_0 = arith.constant 0 : i32
    %c0_i32_1 = arith.constant 0 : i32
    return %c0_i32, %c0_i32_0 : i32, i32
  }
  func.func @transform_1(%arg0: i32) -> (i32, i32) {
    %c0_i32 = arith.constant 0 : i32
    %c0_i32_0 = arith.constant 0 : i32
    %c0_i32_1 = arith.constant 0 : i32
    return %c0_i32, %c0_i32_0 : i32, i32
  }
  func.func @transform_2(%arg0: i32) -> (i32, i32, i32, i32) {
    %c0_i32 = arith.constant 0 : i32
    %c0_i32_0 = arith.constant 0 : i32
    %c0_i32_1 = arith.constant 0 : i32
    %c0_i32_2 = arith.constant 0 : i32
    return %c0_i32, %arg0, %c0_i32_0, %c0_i32_1 : i32, i32, i32, i32
  }
  func.func @transform_3(%arg0: i32) -> (i32, i32, i32, i32) {
    %c0_i32 = arith.constant 0 : i32
    %c0_i32_0 = arith.constant 0 : i32
    %c0_i32_1 = arith.constant 0 : i32
    %c0_i32_2 = arith.constant 0 : i32
    return %c0_i32, %arg0, %c0_i32_0, %c0_i32_1 : i32, i32, i32, i32
  }
}

</mosaic_0001>

<bundles_post_ra>
// kernel: tpu_custom_call.1
= control target key start
LH: loop header
LB: loop body
LE: loop exit
PB: predicated region body
PF: predicated region fallthrough
CT: control target
= control target key end

     0   :  { %8 = vsyncpa [#allocation3], 0  ;;  %s1991_s0 = inlined_call_operand.hbm [shape: f32[1,95], index: 0, kind: input, shape index: {}]   ;;  %s1992_s1 = inlined_call_operand.hbm [shape: f32[95,128], index: 1, kind: input, shape index: {}]   ;;  %s1993_s2 = inlined_call_operand.hbm [shape: f32[3,2,16,95], index: 2, kind: input, shape index: {}]   ;;  %s1994_s3 = inlined_call_operand.hbm [shape: f32[3,2,8,128], index: 3, kind: output, shape index: {}]  }
   0x1   :  { %9 = vsyncpa [#allocation6], 0 }
   0x2   :  { %10 = vsyncpa [#allocation4], 0 }
   0x3   :  { %12 = vsyncpa [#allocation4 + $0x1], 0  ;;  %s1639_s12 = smov 0   ;;  %s1641_s13 = smov 0  }
   0x4   :  { %s1643_s14 = smov 0   ;;  %s1645_s15 = smov 0  }
   0x5 LB: > { %s1660_s16 = sadd.s32 4294967295, %s1598_s15   ;;  %s1113_s17 = sadd.s32 4294967294, %s1598_s15   ;;  %s1598_s15 = sphi %s1645_s15, %s2020_s15   ;;  %s1594_s14 = sphi %s1643_s14, %s2019_s14   ;;  %s1590_s13 = sphi %s1641_s13, %s2018_s13   ;;  %s1586_s12 = sphi %s1639_s12, %s2017_s12  }
   0x6   : > { %s1664_s18 = sadd.s32 1, %s1598_s15   ;;  %s67_s19 = sadd.s32 1, %s1594_s14 }
   0x7   : > { %s64_s20 = ssub.s32 %s1598_s15, %s1664_s18  ;;  %p74_p0 = scmp.ne.s32.totalorder %s1594_s14, %s1590_s13 }
   0x8   : > { %p65_p1 = scmp.eq.s32.totalorder %s64_s20, 0  ;;  %p75_p2 = scmp.eq.s32.totalorder %s1598_s15, 0 }
   0x9   : > { %p80_p3 = scmp.ne.s32.totalorder %s1590_s13, %s1586_s12  ;;  %p1995_p4 = scmp.eq.s32.totalorder %s1660_s16, 0 }
   0xa   : > { %s1676_s21 = scalar_select %p65_p1, %s1594_s14, %s67_s19  }
   0xb   : > { %p1678_p5 = por %p75_p2, %p74_p0  ;;  %p1684_p6 = por %p1995_p4, %p80_p3 }
   0xc   : > { %p104_p7 = scmp.eq.s32.totalorder %s1660_s16, 1  ;;  %p110_p8 = scmp.eq.s32.totalorder %s1113_s17, 1 }
   0xd   : > { %s2000_s22 = scalar_select %p1678_p5, 1, 0 }
   0xe   : > { %s2001_s23 = scalar_select %p1684_p6, 1, 0 }
   0xf   : > { %p1114_p9 = scmp.ge.s32.totalorder %s1598_s15, 1  ;;  %p117_p10 = scmp.lt.s32.totalorder %s1598_s15, 3 }
  0x10   : > { %p1691_p11 = por %p104_p7, %p74_p0  ;;  %p1695_p12 = por %p110_p8, %p80_p3 }
  0x11   : > { %p1699_p13 = pnand %p1114_p9, %p117_p10  ;;  %s1600_s27 = smov [#allocation2]  }
  0x12   : > { %s2002_s24 = scalar_select %p1691_p11, 1, 0 }
  0x13   : > { %s2003_s25 = scalar_select %p1695_p12, 1, 0 }
  0x14   : > { %s2004_s26 = scalar_select %p1699_p13, 1, 0 }
  0x15   : > { %p1400_p1 = pneg %p1699_p13  ;;  %s130_s28 = sshll.u32 %s1600_s27, 4  ;;  %s131_s28 = int_to_ptr.vmem [resolvable:$true] %s130_s28 }
  0x16   : > { %s1601_s29 = smov [#allocation5]   ;;  %s1468_s7 = scalar_lea.hbm %s1991_s0, 16 }
  0x17   : > { %s140_s30 = sshll.u32 %s1601_s29, 4  ;;  %p1707_p0 = pnand %p1400_p1, %p1995_p4  ;;  %s1711_s30 = int_to_ptr.vmem [resolvable:$true] %s140_s30 }
  0x18   : > { %p1469_p2 = scmp.ne.s32.totalorder %s1991_s0, %s1468_s7  ;;  %p1475_p9 = scmp.lt.u32.totalorder %s1468_s7, %s1991_s0 }
  0x19   : > { %p1470_p3 = pneg %p1707_p0 }
  0x1b   : > { %p1471_p7 = pnand %p1470_p3, %p1469_p2 }
  0x1d   : > { %p1472_p8 = pneg %p1471_p7 }
  0x1f   : > { %p1477_p10 = pnand %p1475_p9, %p1472_p8 }
  0x21   : > { %1480 = shalt.err (!%p1477_p10)
}
  0x22   : > { %s1481_s17 = scalar_lea.vmem %s131_s28, 16  ;;  %s1488_s19 = scalar_lea.vmem %s131_s28, 32 }
  0x23   : > { %p1482_p1 = scmp.ne.s32.totalorder %s131_s28, %s1481_s17  ;;  %p1489_p11 = scmp.lt.s32.totalorder %s131_s28, %s131_s28 }
  0x24   : > { %p1490_p6 = scmp.lt.s32.totalorder %s1488_s19, %s1481_s17 }
  0x25   : > { %p1484_p4 = pnand %p1482_p1, %p1470_p3 }
  0x26   : > { %p1491_p13 = por %p1490_p6, %p1489_p11 }
  0x27   : > { %p1485_p12 = pneg %p1484_p4 }
  0x29   : > { %p1492_p5 = pnand %p1491_p13, %p1485_p12 }
  0x2b   : > { %1495 = shalt.err (!%p1492_p5)
}
  0x2c   : > { %1403 = dma.hbm_to_vmem [thread:$0]  (!%p1707_p0), %s1991_s0, 16, %s131_s28, [#allocation3]  }
  0x2d   : > { %s1496_s6 = scalar_lea.hbm %s1992_s1, 1536 }
  0x2e   : > { %p1497_p4 = scmp.ne.s32.totalorder %s1992_s1, %s1496_s6  ;;  %p1503_p5 = scmp.lt.u32.totalorder %s1496_s6, %s1992_s1 }
  0x30   : > { %p1499_p6 = pnand %p1497_p4, %p1470_p3 }
  0x32   : > { %p1500_p11 = pneg %p1499_p6 }
  0x34   : > { %p1505_p12 = pnand %p1503_p5, %p1500_p11 }
  0x36   : > { %1508 = shalt.err (!%p1505_p12)
}
  0x37   : > { %s1509_s28 = scalar_lea.vmem %s1711_s30, 1536  ;;  %p1517_p8 = scmp.lt.s32.totalorder %s1711_s30, %s1711_s30 }
  0x38   : > { %p1510_p13 = scmp.ne.s32.totalorder %s1711_s30, %s1509_s28  ;;  %p1518_p9 = scmp.lt.s32.totalorder %s1509_s28, %s1509_s28 }
  0x3a   : > { %p1512_p2 = pnand %p1510_p13, %p1470_p3  ;;  %p1519_p10 = por %p1518_p9, %p1517_p8 }
  0x3c   : > { %p1513_p7 = pneg %p1512_p2 }
  0x3e   : > { %p1520_p1 = pnand %p1519_p10, %p1513_p7 }
  0x40   : > { %1523 = shalt.err (!%p1520_p1)
}
  0x41   : > { %s1602_s11 = smov 128   ;;  %s1603_s17 = smov 8  }
  0x42   : > { %1406 = dma.hbm_to_vmem [thread:$0]  (!%p1707_p0), %s1992_s1, 1536, %s1711_s30, [#allocation6], %s1602_s11, %s1602_s11, %s1603_s17  }
  0x43   : > { %p1117_p4 = scmp.ge.s32.totalorder %s1598_s15, 2 }
  0x45   : > { %150 = sbr.rel (%p1117_p4) target bundleno = 91 (0x5b), region = 24 }
  0x4c   : > { %s154_s27 = sand.u32 1, %s1598_s15   ;;  %s156_s29 = sand.u32 1, %s1594_s14  }
  0x4d   : > { %s1362_s4 = smul.u32 48, %s156_s29  ;;  %s1145_s5 = sshll.u32 %s1598_s15, 8 }
  0x4e   : > { %p2006_p3 = scmp.ne.s32.totalorder %s2000_s22, 0  ;;  %s164_s8 = scalar_lea.hbm %s1993_s2, %s1145_s5 }
  0x4f   : > { %s1604_s9 = smov 512   ;;  %s158_s28 = scalar_lea.vmem [#allocation7], %s1362_s4 }
  0x50   : > { %s1385_s30 = scalar_select %p2006_p3, [#allocation0], [#allocation11] }
  0x51   : > { %1386 = sst [smem:[#allocation10]] (%p2006_p3), %s1604_s9  ;;  %s177_s11 = sshll.u32 %s158_s28, 4  ;;  %s178_s11 = int_to_ptr.vmem [resolvable:$true] %s177_s11 }
  0x52   : > { %s169_s10 = sld [smem:[%s1385_s30]]   ;;  %s1605_s17 = smov 256  }
  0x53   : > { %1387 = sst [smem:[#allocation10 + $0x1]] (%p2006_p3), %s1605_s17  ;;  %s1606_s19 = smov 2  }
  0x54   : > { %1388 = sst [smem:[#allocation10 + $0x2]] (%p2006_p3), %s1606_s19  ;;  %s1607_s20 = smov 128  }
  0x55   : > { %1389 = sst [smem:[#allocation10 + $0x3]] (%p2006_p3), %s1607_s20  ;;  %s1608_s5 = smov 8  }
  0x56   : > { %1390 = sst [smem:[#allocation10 + $0x4]] (%p2006_p3), %s1607_s20  ;;  %s155_s4 = scalar_lea.sflag [#allocation3], %s154_s27 }
  0x57   : > { %1391 = sst [smem:[#allocation10 + $0x5]] (%p2006_p3), %s1608_s5  ;;  %s1609_s6 = smov [#allocation9]  }
  0x58   : > { %s1120_s29 = sshll.u32 %s169_s10, 26 }
  0x59   : > { %s1121_s30 = sadd.s32 134217728, %s1120_s29 }
  0x5a   : > { %1392 = dma.general (%p2006_p3), %s164_s8, 768, %s178_s11, %s155_s4, %s1609_s6, [#allocation10], %s1121_s30, 0  }
  0x5b PF: > { %p2007_p0 = scmp.ne.s32.totalorder %s2004_s26, 0 }
  0x5c   : > { %p2008_p6 = scmp.eq.s32.totalorder (!%p2007_p0), %s1660_s16, 0 }
  0x5d   : > { %202 = sbr.rel (%p2007_p0) target bundleno = 3595 (0xe0b), region = 32 }
  0x64   : > { %1569 = dma.done.wait (%p2008_p6), [#allocation3], 16   ;;  %p2009_p11 = pmov %p2008_p6 }
  0x65   : > { %p2010_p5 = pmov %p2008_p6 }
  0x66   : > { %1571 = vsyncadd (%p2009_p11), [#allocation3], 4294967280 }
  0x67   : > { %1573 = dma.done.wait (%p2010_p5), [#allocation6], 1536   ;;  %p2011_p12 = pmov %p2010_p5 }
  0x68   : > { %s212_s22 = sand.u32 1, %s1660_s16   ;;  %s1797_s27 = sand.u32 1, %s1590_s13  }
  0x69   : > { %1575 = vsyncadd (%p2011_p12), [#allocation6], 4294965760  ;;  %s1363_s26 = smul.u32 48, %s1797_s27  ;;  %s213_s7 = scalar_lea.sflag [#allocation3], %s212_s22 }
  0x6a   : > { %p2012_p13 = scmp.ne.s32.totalorder %s2001_s23, 0 }
  0x6b   : > { %s1800_s8 = scalar_lea.vmem [#allocation7], %s1363_s26 }
  0x6c   : > { %1577 = dma.done.wait (%p2012_p13), %s213_s7, 768  }
  0x6d   : > { %1579 = vsyncadd (%p2012_p13), %s213_s7, 4294966528  ;;  %v257_v0 = vlaneseq  ;;  %v1810_v3 = vld [vmem:[%s1800_s8] sm:$0xff]  ;;  %v1125_v4 = vld [vmem:[#allocation2] ss:$0 sm:$0xff]  ;;  %vm250_vm0 = vcmask 777216   ;;  %v1610_v10 = vmov 0  }
  0x6e   : > { %v1813_v5 = vld [vmem:[%s1800_s8 + $0x8] sm:$0xff]  ;;  %v248_v6 = vadd.f32 %v1125_v4, %v1810_v3  ;;  %1466 = vset.pattern.permute.xlu0 %v1610_v10  ;;  %1467 = vset.pattern.permute.xlu1 %v1610_v10  ;;  %vm283_vm3 = vcmask 7168   ;;  %vm319_vm8 = vcmask 130112   ;;  %vm322_vm9 = vcmask 122880   ;;  %p2015_p7 = scmp.ne.s32.totalorder %s2002_s24, 0 }
  0x6f   : > { %v1806_v1 = vand.u32 127, %v257_v0  ;;  %v249_v7 = vadd.f32 %v1125_v4, %v1813_v5  ;;  %v1820_v35 = vshrl.u32 %v257_v0, 7 }
  0x70   : > { %v251_v8 = vsel %vm250_vm0, %v248_v6, -inf }
  0x71   : > { %v271_v2 = vsub.s32 15, %v1806_v1  ;;  %252 = vmax.xlane.f32.xlu0 %v251_v8  ;;  %v254_v9 = vsel %vm250_vm0, %v249_v7, -inf  ;;  %v314_v34 = vadd.s32 4294967288, %v1806_v1  ;;  %v312_v36 = vsub.s32 %v1806_v1, %v1820_v35 }
  0x72   : > { %vm300_vm15 = vcmp.eq.s32.totalorder %v1820_v35, 0 }
  0x73   : > { %273 = vbcast.lane.b32.xlu1 %v271_v2, 256  ;;  %v317_v37 = vsub.s32 %v314_v34, %v1820_v35 }
  0x75   : > { %255 = vmax.xlane.f32.xlu0 %v254_v9 }
  0x77   : > { %277 = vbcast.lane.b32.xlu1 %v271_v2, 264 }
  0xe5   : > { %v274_v13 = vpop.permute.xlu1 %273 }
  0xe9   : > { %v278_v22 = vpop.permute.xlu1 %277 }
  0xfe   : > { %v253_v11 = vpop.xlane.xlu0 %252 }
  0xff   : > { %vm261_vm1 = vcmp.lt.s32.totalorder %v253_v11, 0  ;;  %v263_v12 = vxor.u32 2147483647, %v253_v11 }
 0x101   : > { %v265_v14 = vsel %vm261_vm1, %v263_v12, %v253_v11  ;;  %vm350_vm1 = vcmp.eq.s32.totalorder %v1820_v35, 1 }
 0x102   : > { %v256_v15 = vpop.xlane.xlu0 %255  ;;  %v267_v16 = vshra.s32 %v265_v14, 4 }
 0x103   : > { %vm262_vm2 = vcmp.lt.s32.totalorder %v256_v15, 0  ;;  %v264_v17 = vxor.u32 2147483647, %v256_v15 }
 0x104   : > { %v269_v18 = vshll.u32 %v267_v16, 4 }
 0x105   : > { %v266_v19 = vsel %vm262_vm2, %v264_v17, %v256_v15 }
 0x106   : > { %v279_v20 = vor.u32 %v274_v13, %v269_v18  ;;  %v268_v21 = vshra.s32 %v266_v19, 4 }
 0x108   : > { %305 = vperm.xlu0 %1466, %v279_v20   ;;  %v270_v23 = vshll.u32 %v268_v21, 4  ;;  %v284_v25 = vsel %vm283_vm3, %v279_v20, 2147483648 }
 0x10a   : > { %v280_v24 = vor.u32 %v278_v22, %v270_v23 }
 0x10c   : > { %v285_v26 = vsel %vm283_vm3, %v280_v24, 2147483648  ;;  %308 = vperm.xlu1 %1467, %v280_v24  }
 0x10d   : > { %vm286_vm4 = vcmp.gt.s32.totalorder %v284_v25, %v285_v26 }
 0x10e   : > { %v287_v27 = vsel %vm286_vm4, %v284_v25, %v285_v26 }
 0x10f   : > { %v288_v28 = vrot.slane %v287_v27, 4 }
 0x111   : > { %vm289_vm5 = vcmp.gt.s32.totalorder %v287_v27, %v288_v28 }
 0x112   : > { %v290_v29 = vsel %vm289_vm5, %v287_v27, %v288_v28 }
 0x113   : > { %v291_v30 = vrot.slane %v290_v29, 2 }
 0x115   : > { %vm292_vm6 = vcmp.gt.s32.totalorder %v290_v29, %v291_v30 }
 0x116   : > { %v293_v31 = vsel %vm292_vm6, %v290_v29, %v291_v30 }
 0x117   : > { %v294_v32 = vrot.slane %v293_v31, 1 }
 0x119   : > { %vm295_vm7 = vcmp.gt.s32.totalorder %v293_v31, %v294_v32 }
 0x11a   : > { %v296_v33 = vsel %vm295_vm7, %v293_v31, %v294_v32  ;;  %vm382_vm7 = vcmp.eq.s32.totalorder %v1820_v35, 2 }
 0x11b   : > { %1365 = vpush %v296_v33 }
 0x14c   : > { %s1366_s23 = spop %1365 }
 0x14d   : > { %s298_s9 = sand.u32 15, %s1366_s23 }
 0x14e   : > { %s1822_s10 = ssub.s32 15, %s298_s9 }
 0x14f   : > { %v301_v39 = vstv %s1822_s10 }
 0x150   : > { %vm303_vm10 = vcmp.eq.s32.totalorder %v1806_v1, %v301_v39  ;;  %v302_v63 = vsel %vm300_vm15, %v301_v39, 0 }
 0x187   : > { %v306_v38 = vpop.permute.xlu0 %305 }
 0x188   : > { %v313_v41 = vrot.slane %v306_v38, %v312_v36 }
 0x18b   : > { %v309_v40 = vpop.permute.xlu1 %308 }
 0x18c   : > { %v318_v42 = vrot.slane %v309_v40, %v317_v37 }
 0x18e   : > { %v320_v43 = vsel %vm319_vm8, %v318_v42, %v313_v41 }
 0x18f   : > { %v321_v44 = vsel %vm303_vm10, 2147483648, %v320_v43 }
 0x190   : > { %v323_v45 = vsel %vm322_vm9, %v321_v44, 2147483648 }
 0x191   : > { %v325_v46 = vshra.s32 %v323_v45, 16  ;;  %v324_v48 = vand.u32 65535, %v323_v45 }
 0x193   : > { %v327_v47 = vcvt.s32.f32 %v325_v46  ;;  %v326_v50 = vcvt.s32.f32 %v324_v48 }
 0x195   : > { %328 = vmax.xlane.f32.xlu1 %v327_v47 }
 0x222   : > { %v329_v49 = vpop.xlane.xlu1 %328 }
 0x223   : > { %vm330_vm11 = vcmp.eq.f32.partialorder %v327_v47, %v329_v49  ;;  %v335_v52 = vcvt.f32.s32 %v329_v49 }
 0x224   : > { %v331_v51 = vsel %vm330_vm11, %v326_v50, -inf }
 0x225   : > { %332 = vmax.xlane.f32.xlu1 %v331_v51  ;;  %v336_v54 = vshll.u32 %v335_v52, 16 }
 0x2b2   : > { %v333_v53 = vpop.xlane.xlu1 %332 }
 0x2b3   : > { %v334_v55 = vcvt.f32.s32 %v333_v53 }
 0x2b5   : > { %v337_v56 = vadd.s32 %v336_v54, %v334_v55 }
 0x2b7   : > { %v338_v57 = vrot.slane %v337_v56, 4 }
 0x2b9   : > { %vm339_vm12 = vcmp.gt.s32.totalorder %v337_v56, %v338_v57 }
 0x2ba   : > { %v340_v58 = vsel %vm339_vm12, %v337_v56, %v338_v57 }
 0x2bb   : > { %v341_v59 = vrot.slane %v340_v58, 2 }
 0x2bd   : > { %vm342_vm13 = vcmp.gt.s32.totalorder %v340_v58, %v341_v59 }
 0x2be   : > { %v343_v60 = vsel %vm342_vm13, %v340_v58, %v341_v59 }
 0x2bf   : > { %v344_v61 = vrot.slane %v343_v60, 1 }
 0x2c1   : > { %vm345_vm14 = vcmp.gt.s32.totalorder %v343_v60, %v344_v61 }
 0x2c2   : > { %v346_v62 = vsel %vm345_vm14, %v343_v60, %v344_v61  ;;  %vm414_vm14 = vcmp.eq.s32.totalorder %v1820_v35, 3 }
 0x2c3   : > { %1367 = vpush %v346_v62 }
 0x2f4   : > { %s1368_s28 = spop %1367 }
 0x2f5   : > { %s348_s11 = sand.u32 15, %s1368_s28 }
 0x2f6   : > { %s349_s17 = ssub.s32 15, %s348_s11 }
 0x2f7   : > { %v351_v0 = vstv %s349_s17 }
 0x2f8   : > { %v352_v2 = vsel %vm350_vm1, %v351_v0, %v302_v63  ;;  %vm353_vm2 = vcmp.eq.s32.totalorder %v1806_v1, %v351_v0 }
 0x2f9   : > { %v354_v4 = vsel %vm353_vm2, 2147483648, %v321_v44 }
 0x2fa   : > { %v355_v6 = vsel %vm322_vm9, %v354_v4, 2147483648 }
 0x2fb   : > { %v357_v7 = vshra.s32 %v355_v6, 16  ;;  %v356_v9 = vand.u32 65535, %v355_v6 }
 0x2fd   : > { %v359_v8 = vcvt.s32.f32 %v357_v7  ;;  %v358_v11 = vcvt.s32.f32 %v356_v9 }
 0x2ff   : > { %360 = vmax.xlane.f32.xlu0 %v359_v8 }
 0x38c   : > { %v361_v10 = vpop.xlane.xlu0 %360 }
 0x38d   : > { %vm362_vm3 = vcmp.eq.f32.partialorder %v359_v8, %v361_v10  ;;  %v367_v13 = vcvt.f32.s32 %v361_v10 }
 0x38e   : > { %v363_v12 = vsel %vm362_vm3, %v358_v11, -inf }
 0x38f   : > { %364 = vmax.xlane.f32.xlu1 %v363_v12  ;;  %v368_v15 = vshll.u32 %v367_v13, 16 }
 0x41c   : > { %v365_v14 = vpop.xlane.xlu1 %364 }
 0x41d   : > { %v366_v16 = vcvt.f32.s32 %v365_v14 }
 0x41f   : > { %v369_v17 = vadd.s32 %v368_v15, %v366_v16 }
 0x421   : > { %v370_v18 = vrot.slane %v369_v17, 4 }
 0x423   : > { %vm371_vm4 = vcmp.gt.s32.totalorder %v369_v17, %v370_v18 }
 0x424   : > { %v372_v19 = vsel %vm371_vm4, %v369_v17, %v370_v18 }
 0x425   : > { %v373_v20 = vrot.slane %v372_v19, 2 }
 0x427   : > { %vm374_vm5 = vcmp.gt.s32.totalorder %v372_v19, %v373_v20 }
 0x428   : > { %v375_v21 = vsel %vm374_vm5, %v372_v19, %v373_v20  ;;  %vm446_vm5 = vcmp.eq.s32.totalorder %v1820_v35, 4 }
 0x429   : > { %v376_v22 = vrot.slane %v375_v21, 1 }
 0x42b   : > { %vm377_vm6 = vcmp.gt.s32.totalorder %v375_v21, %v376_v22 }
 0x42c   : > { %v378_v23 = vsel %vm377_vm6, %v375_v21, %v376_v22 }
 0x42d   : > { %1369 = vpush %v378_v23 }
 0x45e   : > { %s1370_s19 = spop %1369 }
 0x45f   : > { %s380_s20 = sand.u32 15, %s1370_s19 }
 0x460   : > { %s381_s29 = ssub.s32 15, %s380_s20 }
 0x461   : > { %v383_v24 = vstv %s381_s29 }
 0x462   : > { %v384_v25 = vsel %vm382_vm7, %v383_v24, %v352_v2  ;;  %vm385_vm8 = vcmp.eq.s32.totalorder %v1806_v1, %v383_v24 }
 0x463   : > { %v386_v26 = vsel %vm385_vm8, 2147483648, %v354_v4 }
 0x464   : > { %v387_v27 = vsel %vm322_vm9, %v386_v26, 2147483648 }
 0x465   : > { %v389_v28 = vshra.s32 %v387_v27, 16  ;;  %v388_v30 = vand.u32 65535, %v387_v27 }
 0x467   : > { %v391_v29 = vcvt.s32.f32 %v389_v28  ;;  %v390_v32 = vcvt.s32.f32 %v388_v30 }
 0x469   : > { %392 = vmax.xlane.f32.xlu1 %v391_v29 }
 0x4f6   : > { %v393_v31 = vpop.xlane.xlu1 %392 }
 0x4f7   : > { %vm394_vm10 = vcmp.eq.f32.partialorder %v391_v29, %v393_v31  ;;  %v399_v34 = vcvt.f32.s32 %v393_v31 }
 0x4f8   : > { %v395_v33 = vsel %vm394_vm10, %v390_v32, -inf }
 0x4f9   : > { %396 = vmax.xlane.f32.xlu1 %v395_v33  ;;  %v400_v37 = vshll.u32 %v399_v34, 16 }
 0x586   : > { %v397_v36 = vpop.xlane.xlu1 %396 }
 0x587   : > { %v398_v38 = vcvt.f32.s32 %v397_v36 }
 0x589   : > { %v401_v39 = vadd.s32 %v400_v37, %v398_v38 }
 0x58b   : > { %v402_v40 = vrot.slane %v401_v39, 4 }
 0x58d   : > { %vm403_vm11 = vcmp.gt.s32.totalorder %v401_v39, %v402_v40 }
 0x58e   : > { %v404_v41 = vsel %vm403_vm11, %v401_v39, %v402_v40 }
 0x58f   : > { %v405_v42 = vrot.slane %v404_v41, 2 }
 0x591   : > { %vm406_vm12 = vcmp.gt.s32.totalorder %v404_v41, %v405_v42 }
 0x592   : > { %v407_v43 = vsel %vm406_vm12, %v404_v41, %v405_v42  ;;  %vm478_vm12 = vcmp.eq.s32.totalorder %v1820_v35, 5 }
 0x593   : > { %v408_v44 = vrot.slane %v407_v43, 1 }
 0x595   : > { %vm409_vm13 = vcmp.gt.s32.totalorder %v407_v43, %v408_v44 }
 0x596   : > { %v410_v45 = vsel %vm409_vm13, %v407_v43, %v408_v44 }
 0x597   : > { %1371 = vpush %v410_v45 }
 0x5c8   : > { %s1372_s5 = spop %1371 }
 0x5c9   : > { %s412_s30 = sand.u32 15, %s1372_s5 }
 0x5ca   : > { %s413_s4 = ssub.s32 15, %s412_s30  ;;  %s1142_s30 = sshll.u32 %s1660_s16, 7 }
 0x5cb   : > { %v415_v46 = vstv %s413_s4  ;;  %s1615_s16 = smov [#allocation8]  }
 0x5cc   : > { %v416_v47 = vsel %vm414_vm14, %v415_v46, %v384_v25  ;;  %vm417_vm15 = vcmp.eq.s32.totalorder %v1806_v1, %v415_v46 }
 0x5cd   : > { %v418_v48 = vsel %vm417_vm15, 2147483648, %v386_v26 }
 0x5ce   : > { %v419_v49 = vsel %vm322_vm9, %v418_v48, 2147483648 }
 0x5cf   : > { %v421_v50 = vshra.s32 %v419_v49, 16  ;;  %v420_v52 = vand.u32 65535, %v419_v49 }
 0x5d1   : > { %v423_v51 = vcvt.s32.f32 %v421_v50  ;;  %v422_v54 = vcvt.s32.f32 %v420_v52 }
 0x5d3   : > { %424 = vmax.xlane.f32.xlu1 %v423_v51 }
 0x660   : > { %v425_v53 = vpop.xlane.xlu1 %424 }
 0x661   : > { %vm426_vm1 = vcmp.eq.f32.partialorder %v423_v51, %v425_v53  ;;  %v431_v56 = vcvt.f32.s32 %v425_v53 }
 0x662   : > { %v427_v55 = vsel %vm426_vm1, %v422_v54, -inf }
 0x663   : > { %428 = vmax.xlane.f32.xlu1 %v427_v55  ;;  %v432_v58 = vshll.u32 %v431_v56, 16 }
 0x6f0   : > { %v429_v57 = vpop.xlane.xlu1 %428 }
 0x6f1   : > { %v430_v59 = vcvt.f32.s32 %v429_v57 }
 0x6f3   : > { %v433_v60 = vadd.s32 %v432_v58, %v430_v59  ;;  %v1297_v59 = vpack.c.bf16 %v1813_v5, %v1810_v3  ;;  %v550_v3 = vld [vmem:[#allocation5 + $0x10] sm:$0xff]  ;;  %v551_v5 = vld [vmem:[#allocation5 + $0x18] sm:$0xff] }
 0x6f5   : > { %v434_v61 = vrot.slane %v433_v60, 4 }
 0x6f7   : > { %vm435_vm2 = vcmp.gt.s32.totalorder %v433_v60, %v434_v61 }
 0x6f8   : > { %v436_v62 = vsel %vm435_vm2, %v433_v60, %v434_v61  ;;  %v1611_v60 = vmov 0.0|0.0   ;;  %v1613_v61 = vmov 0.0  }
 0x6f9   : > { %v437_v63 = vrot.slane %v436_v62, 2  ;;  %1296 = vmatprep.subr.bf16.mxu0 %v1611_v60  ;;  %1299 = vmatprep.subr.bf16.mxu1 %v1611_v60 }
 0x6fa   : > { %1298 = vmatpush3.bf16.msra.mxu0 %v1297_v59 }
 0x6fb   : > { %vm438_vm3 = vcmp.gt.s32.totalorder %v436_v62, %v437_v63  ;;  %1318 = vmatprep.subr.bf16.mxu0 %v1611_v60 }
 0x6fc   : > { %v439_v0 = vsel %vm438_vm3, %v436_v62, %v437_v63  ;;  %vm510_vm3 = vcmp.eq.s32.totalorder %v1820_v35, 6  ;;  %v548_v62 = vld [vmem:[#allocation5] sm:$0xff]  ;;  %v549_v63 = vld [vmem:[#allocation5 + $0x8] sm:$0xff] }
 0x6fd   : > { %v440_v2 = vrot.slane %v439_v0, 1 }
 0x6ff   : > { %vm441_vm4 = vcmp.gt.s32.totalorder %v439_v0, %v440_v2 }
 0x700   : > { %v442_v4 = vsel %vm441_vm4, %v439_v0, %v440_v2  ;;  %v1860_v0 = vpack.c.bf16 %v549_v63, %v548_v62  ;;  %v1863_v2 = vpack.c.bf16 %v551_v5, %v550_v3 }
 0x701   : > { %1373 = vpush %v442_v4  ;;  %v552_v4 = vld [vmem:[#allocation5 + $0x20] sm:$0xff] }
 0x702   : > { %1301 = vmatpush3.bf16.msra.mxu1 %v1860_v0 }
 0x703   : > { %1302 = vmatprep.subr.bf16.mxu1 %v1611_v60 }
 0x706   : > { %1304 = vmatpush3.bf16.msra.mxu1 %v1863_v2 }
 0x707   : > { %1305 = vmatprep.subr.bf16.mxu1 %v1611_v60 }
 0x732   : > { %s1374_s6 = spop %1373 }
 0x733   : > { %s444_s22 = sand.u32 15, %s1374_s6 }
 0x734   : > { %s445_s26 = ssub.s32 15, %s444_s22  ;;  %s1947_s22 = scalar_lea.hbm %s1994_s3, %s1142_s30 }
 0x735   : > { %v447_v6 = vstv %s445_s26  ;;  %s1009_s26 = scalar_lea.sflag [#allocation4], %s1797_s27 }
 0x736   : > { %v448_v7 = vsel %vm446_vm5, %v447_v6, %v416_v47  ;;  %vm449_vm6 = vcmp.eq.s32.totalorder %v1806_v1, %v447_v6  ;;  %v553_v6 = vld [vmem:[#allocation5 + $0x28] sm:$0xff] }
 0x737   : > { %v450_v8 = vsel %vm449_vm6, 2147483648, %v418_v48  ;;  %vm637_vm6 = vcmask 1046528  }
 0x738   : > { %v451_v9 = vsel %vm322_vm9, %v450_v8, 2147483648 }
 0x739   : > { %v453_v10 = vshra.s32 %v451_v9, 16  ;;  %v452_v12 = vand.u32 65535, %v451_v9  ;;  %v555_v9 = vld [vmem:[#allocation5 + $0x38] sm:$0xff] }
 0x73b   : > { %v455_v11 = vcvt.s32.f32 %v453_v10  ;;  %v454_v14 = vcvt.s32.f32 %v452_v12  ;;  %v557_v12 = vld [vmem:[#allocation5 + $0x48] sm:$0xff] }
 0x73d   : > { %456 = vmax.xlane.f32.xlu1 %v455_v11 }
 0x7ca   : > { %v457_v13 = vpop.xlane.xlu1 %456 }
 0x7cb   : > { %vm458_vm7 = vcmp.eq.f32.partialorder %v455_v11, %v457_v13  ;;  %v463_v16 = vcvt.f32.s32 %v457_v13  ;;  %v556_v11 = vld [vmem:[#allocation5 + $0x40] sm:$0xff] }
 0x7cc   : > { %v459_v15 = vsel %vm458_vm7, %v454_v14, -inf  ;;  %v1875_v13 = vpack.c.bf16 %v557_v12, %v556_v11  ;;  %v558_v14 = vld [vmem:[#allocation5 + $0x50] sm:$0xff]  ;;  %vm1614_vm7 = vmmov 1  }
 0x7cd   : > { %460 = vmax.xlane.f32.xlu1 %v459_v15  ;;  %v464_v18 = vshll.u32 %v463_v16, 16  ;;  %v559_v15 = vld [vmem:[#allocation5 + $0x58] sm:$0x7f] }
 0x7ce   : > { %v1879_v16 = vpack.c.bf16 %v559_v15, %v558_v14 }
 0x85a   : > { %v461_v17 = vpop.xlane.xlu1 %460 }
 0x85b   : > { %v462_v19 = vcvt.f32.s32 %v461_v17 }
 0x85d   : > { %v465_v20 = vadd.s32 %v464_v18, %v462_v19 }
 0x85f   : > { %v466_v21 = vrot.slane %v465_v20, 4 }
 0x861   : > { %vm467_vm8 = vcmp.gt.s32.totalorder %v465_v20, %v466_v21 }
 0x862   : > { %v468_v22 = vsel %vm467_vm8, %v465_v20, %v466_v21  ;;  %vm1882_vm8 = vmpackc.low %vm637_vm6, %vm1614_vm7 }
 0x863   : > { %v469_v23 = vrot.slane %v468_v22, 2 }
 0x865   : > { %vm470_vm10 = vcmp.gt.s32.totalorder %v468_v22, %v469_v23 }
 0x866   : > { %v471_v24 = vsel %vm470_vm10, %v468_v22, %v469_v23 }
 0x867   : > { %v472_v25 = vrot.slane %v471_v24, 1 }
 0x869   : > { %vm473_vm11 = vcmp.gt.s32.totalorder %v471_v24, %v472_v25 }
 0x86a   : > { %v474_v26 = vsel %vm473_vm11, %v471_v24, %v472_v25 }
 0x86b   : > { %1375 = vpush %v474_v26 }
 0x89c   : > { %s1376_s7 = spop %1375 }
 0x89d   : > { %s476_s23 = sand.u32 15, %s1376_s7 }
 0x89e   : > { %s477_s9 = ssub.s32 15, %s476_s23  ;;  %s1528_s23 = sshll.u32 %s1615_s16, 4  ;;  %s1529_s23 = int_to_ptr.vmem [resolvable:$false] %s1528_s23 }
 0x89f   : > { %v479_v27 = vstv %s477_s9  ;;  %s1530_s9 = scalar_lea.vmem %s1529_s23, 768 }
 0x8a0   : > { %v480_v28 = vsel %vm478_vm12, %v479_v27, %v448_v7  ;;  %vm481_vm13 = vcmp.eq.s32.totalorder %v1806_v1, %v479_v27  ;;  %v1867_v7 = vpack.c.bf16 %v553_v6, %v552_v4 }
 0x8a1   : > { %v482_v29 = vsel %vm481_vm13, 2147483648, %v450_v8  ;;  %v554_v8 = vld [vmem:[#allocation5 + $0x30] sm:$0xff]  ;;  %vm542_vm13 = vcmp.eq.s32.totalorder %v1820_v35, 7  ;;  %v1137_v35 = vld [vmem:[%s1800_s8 + $0x28] sm:$0xff] }
 0x8a2   : > { %v483_v30 = vsel %vm322_vm9, %v482_v29, 2147483648  ;;  %1307 = vmatpush3.bf16.msra.mxu1 %v1867_v7  ;;  %v1871_v10 = vpack.c.bf16 %v555_v9, %v554_v8 }
 0x8a3   : > { %v485_v31 = vshra.s32 %v483_v30, 16  ;;  %v484_v33 = vand.u32 65535, %v483_v30  ;;  %1308 = vmatprep.subr.bf16.mxu1 %v1611_v60  ;;  %v1131_v30 = vld [vmem:[%s1800_s8 + $0x18] sm:$0xff] }
 0x8a5   : > { %v487_v32 = vcvt.s32.f32 %v485_v31  ;;  %v486_v36 = vcvt.s32.f32 %v484_v33 }
 0x8a6   : > { %1310 = vmatpush3.bf16.msra.mxu1 %v1871_v10 }
 0x8a7   : > { %488 = vmax.xlane.f32.xlu1 %v487_v32  ;;  %1311 = vmatprep.subr.bf16.mxu1 %v1611_v60 }
 0x8aa   : > { %1313 = vmatpush3.bf16.msra.mxu1 %v1875_v13 }
 0x8ab   : > { %1314 = vmatprep.subr.bf16.mxu1 %v1611_v60 }
 0x8ae   : > { %1317 = vmatpush3.bf16.msk.msra.mxu1 %vm1882_vm8, %v1879_v16 }
 0x8af   : > { %1343 = vmatprep.subr.bf16.mxu1 %v1611_v60 }
 0x934   : > { %v489_v34 = vpop.xlane.xlu1 %488 }
 0x935   : > { %vm490_vm14 = vcmp.eq.f32.partialorder %v487_v32, %v489_v34  ;;  %v495_v38 = vcvt.f32.s32 %v489_v34 }
 0x936   : > { %v491_v37 = vsel %vm490_vm14, %v486_v36, -inf  ;;  %vm560_vm14 = vcmask 130048  }
 0x937   : > { %492 = vmax.xlane.f32.xlu0 %v491_v37  ;;  %v496_v40 = vshll.u32 %v495_v38, 16 }
 0x9c4   : > { %v493_v39 = vpop.xlane.xlu0 %492 }
 0x9c5   : > { %v494_v41 = vcvt.f32.s32 %v493_v39 }
 0x9c7   : > { %v497_v42 = vadd.s32 %v496_v40, %v494_v41 }
 0x9c9   : > { %v498_v43 = vrot.slane %v497_v42, 4 }
 0x9cb   : > { %vm499_vm15 = vcmp.gt.s32.totalorder %v497_v42, %v498_v43 }
 0x9cc   : > { %v500_v44 = vsel %vm499_vm15, %v497_v42, %v498_v43 }
 0x9cd   : > { %v501_v45 = vrot.slane %v500_v44, 2 }
 0x9cf   : > { %vm502_vm1 = vcmp.gt.s32.totalorder %v500_v44, %v501_v45 }
 0x9d0   : > { %v503_v46 = vsel %vm502_vm1, %v500_v44, %v501_v45 }
 0x9d1   : > { %v504_v47 = vrot.slane %v503_v46, 1 }
 0x9d3   : > { %vm505_vm2 = vcmp.gt.s32.totalorder %v503_v46, %v504_v47 }
 0x9d4   : > { %v506_v48 = vsel %vm505_vm2, %v503_v46, %v504_v47 }
 0x9d5   : > { %1377 = vpush %v506_v48 }
 0xa06   : > { %s1378_s10 = spop %1377 }
 0xa07   : > { %s508_s28 = sand.u32 15, %s1378_s10 }
 0xa08   : > { %s509_s11 = ssub.s32 15, %s508_s28 }
 0xa09   : > { %v511_v49 = vstv %s509_s11 }
 0xa0a   : > { %v1847_v50 = vsel %vm510_vm3, %v511_v49, %v480_v28  ;;  %vm513_vm4 = vcmp.eq.s32.totalorder %v1806_v1, %v511_v49 }
 0xa0b   : > { %v514_v51 = vsel %vm513_vm4, 2147483648, %v482_v29  ;;  %v1130_v29 = vld [vmem:[%s1800_s8 + $0x10] sm:$0xff] }
 0xa0c   : > { %v515_v52 = vsel %vm322_vm9, %v514_v51, 2147483648  ;;  %vm1612_vm9 = vmmov 0   ;;  %v1319_v33 = vpack.c.bf16 %v1131_v30, %v1130_v29 }
 0xa0d   : > { %v517_v53 = vshra.s32 %v515_v52, 16  ;;  %v516_v55 = vand.u32 65535, %v515_v52  ;;  %1198 = vmatprep.mubr.msk.f32.mxu0 %vm1612_vm9, %v1613_v61  ;;  %1225 = vmatprep.mubr.msk.f32.mxu1 %vm1612_vm9, %v1613_v61 }
 0xa0f   : > { %v519_v54 = vcvt.s32.f32 %v517_v53  ;;  %v518_v57 = vcvt.s32.f32 %v516_v55 }
 0xa11   : > { %520 = vmax.xlane.f32.xlu1 %v519_v54 }
 0xa9e   : > { %v521_v56 = vpop.xlane.xlu1 %520 }
 0xa9f   : > { %vm522_vm5 = vcmp.eq.f32.partialorder %v519_v54, %v521_v56  ;;  %v527_v18 = vcvt.f32.s32 %v521_v56 }
 0xaa0   : > { %v523_v58 = vsel %vm522_vm5, %v518_v57, -inf }
 0xaa1   : > { %524 = vmax.xlane.f32.xlu0 %v523_v58  ;;  %v528_v20 = vshll.u32 %v527_v18, 16 }
 0xb2e   : > { %v525_v19 = vpop.xlane.xlu0 %524 }
 0xb2f   : > { %v526_v21 = vcvt.f32.s32 %v525_v19 }
 0xb31   : > { %v529_v22 = vadd.s32 %v528_v20, %v526_v21 }
 0xb33   : > { %v530_v23 = vrot.slane %v529_v22, 4 }
 0xb35   : > { %vm531_vm10 = vcmp.gt.s32.totalorder %v529_v22, %v530_v23 }
 0xb36   : > { %v532_v24 = vsel %vm531_vm10, %v529_v22, %v530_v23 }
 0xb37   : > { %v533_v25 = vrot.slane %v532_v24, 2 }
 0xb39   : > { %vm534_vm11 = vcmp.gt.s32.totalorder %v532_v24, %v533_v25 }
 0xb3a   : > { %v535_v26 = vsel %vm534_vm11, %v532_v24, %v533_v25 }
 0xb3b   : > { %v536_v27 = vrot.slane %v535_v26, 1 }
 0xb3d   : > { %vm537_vm12 = vcmp.gt.s32.totalorder %v535_v26, %v536_v27 }
 0xb3e   : > { %v538_v28 = vsel %vm537_vm12, %v535_v26, %v536_v27 }
 0xb3f   : > { %1379 = vpush %v538_v28 }
 0xb70   : > { %s1380_s17 = spop %1379 }
 0xb71   : > { %s540_s19 = sand.u32 15, %s1380_s17 }
 0xb72   : > { %s541_s20 = ssub.s32 15, %s540_s19 }
 0xb73   : > { %v543_v31 = vstv %s541_s20 }
 0xb74   : > { %v544_v32 = vsel %vm542_vm13, %v543_v31, %v1847_v50 }
 0xb75   : > { %vm545_vm15 = vcmp.eq.s32.totalorder %v1806_v1, %v544_v32  ;;  %v1136_v1 = vld [vmem:[%s1800_s8 + $0x20] sm:$0xff]  ;;  %s1364_s8 = smul.u32 24, %s1797_s27 }
 0xb76   : > { %v1126_v34 = vsel %vm545_vm15, 1.0, %v1613_v61  ;;  %v1341_v38 = vpack.c.bf16 %v1137_v35, %v1136_v1 }
 0xb77   : > { %1199 = vmatmul.mubr.msk.f32.vlgmr.msra.gmra.mrb[0].mxu0 %vm560_vm14, %v1126_v34  ;;  %s238_s29 = scalar_lea.vmem [#allocation8], %s1364_s8 }
 0xb78   : > { %1320 = vmatpush3.bf16.msra.mxu0 %v1319_v33  ;;  %1232 = vmatprep.mubr.msk.f32.mxu0 %vm1612_vm9, %v1613_v61  ;;  %s1021_s5 = sshll.u32 %s238_s29, 4  ;;  %s1942_s5 = int_to_ptr.vmem [resolvable:$true] %s1021_s5 }
 0xb79   : > { %1321 = vmatprep.subr.bf16.mxu0 %v1611_v60  ;;  %s1524_s7 = scalar_lea.vmem %s1942_s5, 384  ;;  %p1531_p10 = scmp.lt.s32.totalorder %s1942_s5, %s1529_s23 }
 0xb7a   : > { %p1525_p2 = scmp.ne.s32.totalorder %s1942_s5, %s1524_s7  ;;  %p1532_p1 = scmp.lt.s32.totalorder %s1530_s9, %s1524_s7 }
 0xb7b   : > { %1233 = vmatmul.mubr.msk.f32.vlgmr.msra.gmra.mrb[2].mxu0 %vm560_vm14, %v1126_v34 }
 0xb7c   : > { %1323 = vmatpush3.bf16.msra.mxu0 %v1860_v0  ;;  %1259 = vmatprep.mubr.msk.f32.mxu0 %vm1612_vm9, %v1613_v61  ;;  %p1526_p8 = pnand %p1525_p2, %p2015_p7  ;;  %p1533_p3 = por %p1532_p1, %p1531_p10 }
 0xb7d   : > { %1324 = vmatprep.subr.bf16.mxu0 %v1611_v60 }
 0xb7e   : > { %p1527_p9 = pneg %p1526_p8 }
 0xb80   : > { %1326 = vmatpush3.bf16.msra.mxu0 %v1863_v2  ;;  %p1534_p0 = pnand %p1533_p3, %p1527_p9 }
 0xb81   : > { %1327 = vmatprep.subr.bf16.mxu0 %v1611_v60 }
 0xb84   : > { %1329 = vmatpush3.bf16.msra.mxu0 %v1867_v7 }
 0xb85   : > { %1330 = vmatprep.subr.bf16.mxu0 %v1611_v60 }
 0xb88   : > { %1332 = vmatpush3.bf16.msra.mxu0 %v1871_v10 }
 0xb89   : > { %1333 = vmatprep.subr.bf16.mxu0 %v1611_v60 }
 0xb8c   : > { %1335 = vmatpush3.bf16.msra.mxu0 %v1875_v13 }
 0xb8d   : > { %1336 = vmatprep.subr.bf16.mxu0 %v1611_v60 }
 0xb90   : > { %1339 = vmatpush3.bf16.msk.msra.mxu0 %vm1882_vm8, %v1879_v16 }
 0xb91   : > { %1340 = vmatprep.subr.bf16.mxu0 %v1611_v60 }
 0xc4a   : > { %v630_v36 = vpop.f32.mrb[0].mxu0 }
 0xc4b   : > { %v1200_v37 = vpop.f32.mrb[1].mxu0  ;;  %1226 = vmatmul.mubr.msk.f32.vlgmr.msra.gmra.mrb[0].mxu1 %vm250_vm0, %v630_v36 }
 0xc4c   : > { %1345 = vmatpush3.bf16.msra.mxu1 %v1860_v0  ;;  %1293 = vmatprep.mubr.msk.f32.mxu1 %vm1612_vm9, %v1613_v61 }
 0xc4d   : > { %1346 = vmatprep.subr.bf16.mxu1 %v1611_v60 }
 0xc4e   : > { %v781_v39 = vpop.f32.mrb[2].mxu0 }
 0xc4f   : > { %v1234_v40 = vpop.f32.mrb[3].mxu0  ;;  %1260 = vmatmul.mubr.msk.f32.vlgmr.msra.gmra.mrb[4].mxu0 %vm250_vm0, %v781_v39 }
 0xc50   : > { %1342 = vmatpush3.bf16.msra.mxu0 %v1341_v38  ;;  %1266 = vmatprep.mubr.msk.f32.mxu0 %vm1612_vm9, %v1613_v61 }
 0xc51   : > { %1348 = vmatpush3.bf16.msra.mxu1 %v1863_v2 }
 0xc52   : > { %1349 = vmatprep.subr.bf16.mxu1 %v1611_v60 }
 0xc53   : > { %1267 = vmatmul.mubr.msk.f32.vlgmr.msra.gmra.mrb[6].mxu0 %vm560_vm14, %v1126_v34 }
 0xc55   : > { %1351 = vmatpush3.bf16.msra.mxu1 %v1867_v7 }
 0xc56   : > { %1352 = vmatprep.subr.bf16.mxu1 %v1611_v60 }
 0xc59   : > { %1354 = vmatpush3.bf16.msra.mxu1 %v1871_v10 }
 0xc5a   : > { %1355 = vmatprep.subr.bf16.mxu1 %v1611_v60 }
 0xc5d   : > { %1357 = vmatpush3.bf16.msra.mxu1 %v1875_v13 }
 0xc5e   : > { %1358 = vmatprep.subr.bf16.mxu1 %v1611_v60 }
 0xc61   : > { %1361 = vmatpush3.bf16.msk.msra.mxu1 %vm1882_vm8, %v1879_v16 }
 0xd1e   : > { %v707_v41 = vpop.f32.mrb[0].mxu1 }
 0xd1f   : > { %711 = vst [vmem:[%s238_s29] sm:$0xff] %v707_v41  ;;  %v1227_v42 = vpop.f32.mrb[1].mxu1 }
 0xd22   : > { %v854_v43 = vpop.f32.mrb[4].mxu0 }
 0xd23   : > { %1135 = vst [vmem:[%s238_s29 + $0x8] sm:$0xff] %v854_v43  ;;  %v1261_v44 = vpop.f32.mrb[5].mxu0 }
 0xd26   : > { %v929_v45 = vpop.f32.mrb[6].mxu0 }
 0xd27   : > { %v1268_v46 = vpop.f32.mrb[7].mxu0  ;;  %1294 = vmatmul.mubr.msk.f32.vlgmr.msra.gmra.mrb[2].mxu1 %vm250_vm0, %v929_v45 }
 0xdfa   : > { %v1002_v47 = vpop.f32.mrb[2].mxu1 }
 0xdfb   : > { %1141 = vst [vmem:[%s238_s29 + $0x10] sm:$0xff] %v1002_v47  ;;  %v1295_v48 = vpop.f32.mrb[3].mxu1 }
 0xdfc   : > { %1537 = shalt.err (!%p1534_p0)
}
 0xdfd   : > { %s1538_s10 = scalar_lea.hbm %s1947_s22, 384  ;;  %s1542_s17 = scalar_lea.hbm %s1994_s3, 768 }
 0xdfe   : > { %p1539_p6 = scmp.ne.s32.totalorder %s1947_s22, %s1538_s10  ;;  %p1543_p12 = scmp.lt.u32.totalorder %s1947_s22, %s1994_s3 }
 0xdff   : > { %p1544_p13 = scmp.lt.u32.totalorder %s1542_s17, %s1538_s10  ;;  %p1546_p8 = scmp.lt.u32.totalorder %s1538_s10, %s1947_s22 }
 0xe00   : > { %p1540_p11 = pnand %p1539_p6, %p2015_p7 }
 0xe01   : > { %p1545_p2 = por %p1544_p13, %p1543_p12 }
 0xe02   : > { %p1541_p5 = pneg %p1540_p11 }
 0xe03   : > { %p1547_p9 = por %p1546_p8, %p1545_p2 }
 0xe05   : > { %p1548_p10 = pnand %p1547_p9, %p1541_p5 }
 0xe07   : > { %1551 = shalt.err (!%p1548_p10)
}
 0xe08   : > { %s1616_s8 = smov 128   ;;  %s1617_s29 = smov 256  }
 0xe09   : > { %s1618_s30 = smov 8  }
 0xe0a   : > { %1398 = dma.vmem_to_hbm [thread:$0]  (%p2015_p7), %s1942_s5, 384, %s1947_s22, %s1009_s26, %s1616_s8, %s1617_s29, %s1618_s30  }
 0xe0b PF: > { %s1036_s4 = sand.u32 1, %s1586_s12   ;;  %p2016_p1 = scmp.ne.s32.totalorder %s2003_s25, 0 }
 0xe0c   : > { %s1037_s6 = scalar_lea.sflag [#allocation4], %s1036_s4 }
 0xe0d   : > { %p1408_p3 = pnand %p1117_p4, %p2016_p1 }
 0xe0f   : > { %1581 = dma.done.wait (!%p1408_p3), %s1037_s6, 384  }
 0xe10   : > { %1583 = vsyncadd (!%p1408_p3), %s1037_s6, 4294966912  ;;  %p15_p0 = scmp.ge.s32.totalorder %s1664_s18, 4   ;;  %s2017_s12 = smov %s1590_s13 }
 0xe11   : > { %s2018_s13 = smov %s1594_s14  ;;  %s2019_s14 = smov %s1676_s21 }
 0xe12   : > { %s2020_s15 = smov %s1664_s18  ;;  %17 = sbr.rel (!%p15_p0) target bundleno = 5 (0x5), region = 93 }
 0xe19   :  { %1042 = vsyncpa [#allocation3], 1 }
 0xe1a   :  { %1044 = vsyncpa [#allocation3 + $0x1], 1 }
 0xe1b   :  { %1045 = vsyncpa [#allocation6], 1 }
 0xe1c   :  { %1046 = vsyncpa [#allocation4], 1 }
 0xe1d   :  { %1048 = vsyncpa [#allocation4 + $0x1], 1 }

</bundles_post_ra>
